<compile_context>
chip_gen: v7x
topology: tpu7x:2x2x1
jax: 0.10.0
libtpu: 0.0.40
codegen_flags: <defaults>
</compile_context>

<pallas_src>
import functools
import math

import jax
import jax.numpy as jnp
from jax.experimental import pallas as pl
from jax.experimental.pallas import tpu as pltpu


def _round_up(x, m):
    return (x + m - 1) // m * m


def _largest_divisor_tile(dim, unit, cap):
    """Largest multiple-of-`unit` divisor of `dim` that is <= cap.

    `dim` is assumed to already be a multiple of `unit`; always returns >= unit.
    """
    best = unit
    c = unit
    limit = min(cap, dim)
    while c <= limit:
        if dim % c == 0:
            best = c
        c += unit
    return best


def _pick_tm(batch, sublane, cap=256):
    m_aligned = _round_up(batch, sublane)
    if m_aligned <= cap:
        return m_aligned, m_aligned
    tm = _largest_divisor_tile(m_aligned, sublane, cap)
    return tm, m_aligned


def _pick_tn(n_pad):
    # Prefer >= 2 N tiles so v7x's two TensorCores both get work when the
    # batch axis collapses to a single tile. Tiles are 128-multiples that
    # divide n_pad exactly -> zero padding beyond lane alignment.
    if n_pad >= 256:
        return _largest_divisor_tile(n_pad, 128, min(512, n_pad // 2))
    return n_pad


def _pick_tk(k_pad, tm, tn, in_bytes, budget_bytes=12 * 1024 * 1024,
             tk_cap=None):
    def working_set(tk):
        # double-buffered x and w panels + double-buffered f32 out tile + bias
        return (2 * (tm * tk + tk * tn) * in_bytes
                + 2 * tm * tn * 4 + 2 * tn * 4)

    cap = k_pad if tk_cap is None else min(tk_cap, k_pad)
    if cap == k_pad and working_set(k_pad) <= budget_bytes:
        return k_pad  # whole reduction in one tile: no K grid axis needed
    best = 128
    c = 128
    while c <= min(cap, k_pad - 1) or (c == k_pad and c <= cap):
        if k_pad % c == 0 and working_set(c) <= budget_bytes:
            best = c
        c += 128
    return best


def _adapter_kernel(x_ref, w_ref, b_ref, o_ref):
    # Whole reduction dim in one tile: one MXU matmul + bias per output tile.
    o_ref[...] = (
        jnp.dot(x_ref[...], w_ref[...], preferred_element_type=jnp.float32)
        + b_ref[...])


def _adapter_kernel_ksplit(x_ref, w_ref, b_ref, o_ref):
    # K-reduction fallback: accumulate straight into the resident f32 output
    # tile (its index_map ignores k); init with the broadcast bias at k == 0.
    @pl.when(pl.program_id(2) == 0)
    def _():
        o_ref[...] = jnp.broadcast_to(b_ref[...], o_ref.shape)

    o_ref[...] += jnp.dot(
        x_ref[...], w_ref[...], preferred_element_type=jnp.float32)


def prepare_adapter_params(weight, bias, *, compute_dtype=None):
    """One-time (init-time) parameter prep. Do NOT call per forward pass.

    weight: (out_dim, in_dim)  -- torch Linear convention
    bias:   (out_dim,)
    compute_dtype: optional MXU input dtype for the weight (e.g. jnp.bfloat16
                   on v5e/v6e/v7x); accumulation and output stay float32.
    Returns (w_t_padded (K_pad, N_pad), bias_padded (1, N_pad) float32).
    """
    out_dim, in_dim = weight.shape
    k_pad = _round_up(in_dim, 128)
    n_pad = _round_up(out_dim, 128)
    w_t = weight.T  # (in_dim, out_dim)
    if compute_dtype is not None:
        w_t = w_t.astype(compute_dtype)
    w_t = jnp.pad(w_t, ((0, k_pad - in_dim), (0, n_pad - out_dim)))
    b = jnp.pad(bias.astype(jnp.float32), (0, n_pad - out_dim))
    return w_t, b.reshape(1, n_pad)


@functools.partial(jax.jit,
                   static_argnames=("out_dim", "compute_dtype", "tk_cap"))
def adapter_forward(x, w_t_pad, b_pad, *, out_dim, compute_dtype=None,
                    tk_cap=None):
    """Equivalent of torch.nn.Linear(in_dim, out_dim)(x).to(torch.float32).

    x:        (batch, in_dim)
    w_t_pad:  (K_pad, N_pad) pre-transposed / pre-padded weight from
              prepare_adapter_params (optionally pre-cast to bf16).
    b_pad:    (1, N_pad) float32 padded bias from prepare_adapter_params.
    returns   (batch, out_dim) float32
    """
    batch, in_dim = x.shape
    k_pad, n_pad = w_t_pad.shape

    if compute_dtype is not None:
        x = x.astype(compute_dtype)          # x is small; weight was cast at init

    x_bytes = jnp.dtype(x.dtype).itemsize
    w_bytes = jnp.dtype(w_t_pad.dtype).itemsize
    sublane = {4: 8, 2: 16, 1: 32}[x_bytes]  # dtype-aware second-minor minimum

    tm, m_pad = _pick_tm(batch, sublane)
    tn = _pick_tn(n_pad)
    tk = _pick_tk(k_pad, tm, tn, max(x_bytes, w_bytes), tk_cap=tk_cap)

    if (m_pad, k_pad) != (batch, in_dim):
        x = jnp.pad(x, ((0, m_pad - batch), (0, k_pad - in_dim)))

    cost = pl.CostEstimate(
        flops=2 * m_pad * n_pad * k_pad,
        transcendentals=0,
        bytes_accessed=(x_bytes * m_pad * k_pad + w_bytes * k_pad * n_pad
                        + 4 * (m_pad * n_pad + n_pad)))

    if tk == k_pad:
        # Single K tile: no reduction axis, no accumulator, two parallel axes.
        out = pl.pallas_call(
            _adapter_kernel,
            out_shape=jax.ShapeDtypeStruct((m_pad, n_pad), jnp.float32),
            grid_spec=pltpu.PrefetchScalarGridSpec(
                num_scalar_prefetch=0,
                grid=(m_pad // tm, n_pad // tn),
                in_specs=[
                    pl.BlockSpec((tm, k_pad), lambda i, j: (i, 0)),
                    pl.BlockSpec((k_pad, tn), lambda i, j: (0, j)),
                    pl.BlockSpec((1, tn), lambda i, j: (0, j)),
                ],
                out_specs=pl.BlockSpec((tm, tn), lambda i, j: (i, j)),
            ),
            compiler_params=pltpu.CompilerParams(
                dimension_semantics=("parallel", "parallel")),
            cost_estimate=cost,
        )(x, w_t_pad, b_pad)
    else:
        # K-split fallback (very large in_dim): accumulate into o_ref directly.
        out = pl.pallas_call(
            _adapter_kernel_ksplit,
            out_shape=jax.ShapeDtypeStruct((m_pad, n_pad), jnp.float32),
            grid_spec=pltpu.PrefetchScalarGridSpec(
                num_scalar_prefetch=0,
                grid=(m_pad // tm, n_pad // tn, k_pad // tk),
                in_specs=[
                    pl.BlockSpec((tm, tk), lambda i, j, k: (i, k)),
                    pl.BlockSpec((tk, tn), lambda i, j, k: (k, j)),
                    pl.BlockSpec((1, tn), lambda i, j, k: (0, j)),
                ],
                out_specs=pl.BlockSpec((tm, tn), lambda i, j, k: (i, j)),
            ),
            compiler_params=pltpu.CompilerParams(
                dimension_semantics=("parallel", "parallel", "arbitrary")),
            cost_estimate=cost,
        )(x, w_t_pad, b_pad)

    return out[:batch, :out_dim]


if __name__ == "__main__":
    keys = jax.random.split(jax.random.PRNGKey(0), 9)

    def make_params(kw, kb, in_dim, out_dim):
        bound = 1.0 / math.sqrt(in_dim)
        w = jax.random.uniform(kw, (out_dim, in_dim), minval=-bound,
                               maxval=bound, dtype=jnp.float32)
        b = jax.random.uniform(kb, (out_dim,), minval=-bound,
                               maxval=bound, dtype=jnp.float32)
        return w, b

    # Case 1: small shapes consistent with the module forward (x: (batch, in_dim)).
    batch, in_dim, out_dim = 8, 32, 64
    x = jax.random.normal(keys[0], (batch, in_dim), dtype=jnp.float32)
    w, b = make_params(keys[1], keys[2], in_dim, out_dim)
    w_t, b_p = prepare_adapter_params(w, b)          # once, at "init" time
    y = jax.block_until_ready(adapter_forward(x, w_t, b_p, out_dim=out_dim))
    y_ref = (x @ w.T + b).astype(jnp.float32)
    assert y.shape == (batch, out_dim) and y.dtype == jnp.float32
    assert jnp.allclose(y, y_ref, atol=1e-4, rtol=1e-4)

    # Case 2: ragged dims exercising the pad-minimizing single-K-tile path
    # (out_dim 320 -> N_pad 384, tn 128; in_dim 1152 -> K stays 1152, one tile).
    batch2, in_dim2, out_dim2 = 64, 1152, 320
    x2 = jax.random.normal(keys[3], (batch2, in_dim2), dtype=jnp.float32)
    w2, b2 = make_params(keys[4], keys[5], in_dim2, out_dim2)
    w2_t, b2_p = prepare_adapter_params(w2, b2)
    y2 = jax.block_until_ready(adapter_forward(x2, w2_t, b2_p, out_dim=out_dim2))
    y2_ref = (x2 @ w2.T + b2).astype(jnp.float32)
    assert y2.shape == (batch2, out_dim2) and y2.dtype == jnp.float32
    assert jnp.allclose(y2, y2_ref, atol=2e-3, rtol=2e-3)

    # Case 2b: force the K-split fallback (3 reduction steps) for coverage.
    y2b = jax.block_until_ready(
        adapter_forward(x2, w2_t, b2_p, out_dim=out_dim2, tk_cap=384))
    assert jnp.allclose(y2b, y2_ref, atol=2e-3, rtol=2e-3)

    # Case 3: bf16 compute path — weight cast ONCE at init, f32 accumulate/out.
    batch3, in_dim3, out_dim3 = 8, 256, 384
    x3 = jax.random.normal(keys[6], (batch3, in_dim3), dtype=jnp.float32)
    w3, b3 = make_params(keys[7], keys[8], in_dim3, out_dim3)
    w3_t, b3_p = prepare_adapter_params(w3, b3, compute_dtype=jnp.bfloat16)
    y3 = jax.block_until_ready(
        adapter_forward(x3, w3_t, b3_p, out_dim=out_dim3,
                        compute_dtype=jnp.bfloat16))
    # Reference with bf16-rounded inputs (precision change is intentional).
    x3_bf = x3.astype(jnp.bfloat16).astype(jnp.float32)
    w3_bf = w3.astype(jnp.bfloat16).astype(jnp.float32)
    y3_ref = (x3_bf @ w3_bf.T + b3).astype(jnp.float32)
    assert y3.shape == (batch3, out_dim3) and y3.dtype == jnp.float32
    assert jnp.allclose(y3, y3_ref, atol=5e-2, rtol=5e-2)

    print("KERNEL_OK")
</pallas_src>

<mosaic_0001>
module attributes {stable_mosaic.version = 11 : i64} {
  func.func @_adapter_kernel(%arg0: i32, %arg1: i32, %arg2: memref<8x128xf32, #tpu.memory_space<vmem>>, %arg3: memref<128x128xf32, #tpu.memory_space<vmem>>, %arg4: memref<1x128xf32, #tpu.memory_space<vmem>>, %arg5: memref<8x128xf32, #tpu.memory_space<vmem>>) attributes {dimension_semantics = [#tpu.dimension_semantics<parallel>, #tpu.dimension_semantics<parallel>], iteration_bounds = array<i64: 1, 1>, scalar_prefetch = 0 : i64, scratch_operands = 0 : i64, tpu.core_type = #tpu.core_type<tc>, window_params = [{transform_indices = @transform_0, window_bounds = array<i64: 8, 128>}, {transform_indices = @transform_1, window_bounds = array<i64: 128, 128>}, {transform_indices = @transform_2, window_bounds = array<i64: 1, 128>}, {transform_indices = @transform_3, window_bounds = array<i64: 8, 128>}]} {
    %c0 = arith.constant 0 : index
    %c0_0 = arith.constant 0 : index
    %0 = vector.load %arg2[%c0, %c0_0] : memref<8x128xf32, #tpu.memory_space<vmem>>, vector<8x128xf32>
    %c0_1 = arith.constant 0 : index
    %c0_2 = arith.constant 0 : index
    %1 = vector.load %arg3[%c0_1, %c0_2] : memref<128x128xf32, #tpu.memory_space<vmem>>, vector<128x128xf32>
    %cst = arith.constant dense<0.000000e+00> : vector<8x128xf32>
    %2 = tpu.matmul %0, %1, %cst {dimension_numbers = #tpu.dot_dimension_numbers<[1], [0], [0], [1], [0, 0, 1, 1], [], []>} : vector<8x128xf32>, vector<128x128xf32>, vector<8x128xf32> -> vector<8x128xf32>
    %c0_3 = arith.constant 0 : index
    %c0_4 = arith.constant 0 : index
    %3 = vector.load %arg4[%c0_3, %c0_4] : memref<1x128xf32, #tpu.memory_space<vmem>>, vector<1x128xf32>
    %4 = vector.broadcast %3 : vector<1x128xf32> to vector<8x128xf32>
    %5 = arith.addf %2, %4 : vector<8x128xf32>
    %c0_5 = arith.constant 0 : index
    %c0_6 = arith.constant 0 : index
    %6 = vector.load %arg5[%c0_5, %c0_6] : memref<8x128xf32, #tpu.memory_space<vmem>>, vector<8x128xf32>
    tpu.vector_store %arg5[%c0_5, %c0_6], %5 {strides = array<i32>} : memref<8x128xf32, #tpu.memory_space<vmem>>, vector<8x128xf32>,
    return
  }
  func.func @transform_0(%arg0: i32, %arg1: i32) -> (i32, i32) {
    %c0_i32 = arith.constant 0 : i32
    %c0_i32_0 = arith.constant 0 : i32
    return %arg0, %c0_i32 : i32, i32
  }
  func.func @transform_1(%arg0: i32, %arg1: i32) -> (i32, i32) {
    %c0_i32 = arith.constant 0 : i32
    %c0_i32_0 = arith.constant 0 : i32
    return %c0_i32, %arg1 : i32, i32
  }
  func.func @transform_2(%arg0: i32, %arg1: i32) -> (i32, i32) {
    %c0_i32 = arith.constant 0 : i32
    %c0_i32_0 = arith.constant 0 : i32
    return %c0_i32, %arg1 : i32, i32
  }
  func.func @transform_3(%arg0: i32, %arg1: i32) -> (i32, i32) {
    %c0_i32 = arith.constant 0 : i32
    return %arg0, %arg1 : i32, i32
  }
}

</mosaic_0001>

<bundles_post_ra>
// kernel: adapter_forward.1
= control target key start
LH: loop header
LB: loop body
LE: loop exit
PB: predicated region body
PF: predicated region fallthrough
CT: control target
= control target key end

     0   :  { %8 = vsyncpa [#allocation3], 0  ;;  %s328_s0 = inlined_call_operand.vmem [shape: f32[8,128], index: 0, kind: input, shape index: {}]   ;;  %s329_s1 = inlined_call_operand.hbm [shape: f32[128,128], index: 1, kind: input, shape index: {}]   ;;  %s330_s2 = inlined_call_operand.vmem [shape: f32[1,128], index: 2, kind: input, shape index: {}]   ;;  %s331_s3 = inlined_call_operand.hbm [shape: f32[8,128], index: 3, kind: output, shape index: {}]  }
   0x1   :  { %9 = vsyncpa [#allocation4], 0  ;;  %s271_s12 = smov [#allocation2]   ;;  %s223_s16 = scalar_lea.hbm %s329_s1, 2048 }
   0x2   :  { %s17_s13 = sshll.u32 %s271_s12, 4  ;;  %p224_p0 = scmp.ne.s32.totalorder %s329_s1, %s223_s16  ;;  %s18_s13 = int_to_ptr.vmem [resolvable:$true] %s17_s13 }
   0x3   :  { %p227_p1 = scmp.lt.u32.totalorder %s223_s16, %s329_s1 }
   0x5   :  { %p229_p2 = pnand %p227_p1, %p224_p0 }
   0x7   :  { %232 = shalt.err (!%p229_p2)
}
   0x8   :  { %s233_s21 = scalar_lea.vmem %s18_s13, 2048  ;;  %p238_p4 = scmp.lt.s32.totalorder %s18_s13, %s18_s13 }
   0x9   :  { %p234_p3 = scmp.ne.s32.totalorder %s18_s13, %s233_s21  ;;  %p239_p5 = scmp.lt.s32.totalorder %s233_s21, %s233_s21 }
   0xb   :  { %p240_p6 = por %p239_p5, %p238_p4 }
   0xd   :  { %p241_p7 = pnand %p240_p6, %p234_p3 }
   0xf   :  { %244 = shalt.err (!%p241_p7)
}
  0x10   :  { %s272_s22 = smov 128   ;;  %s273_s23 = smov 8  }
  0x11   :  { %23 = dma.hbm_to_vmem [thread:$0]  %s329_s1, 2048, %s18_s13, [#allocation3], %s272_s22, %s272_s22, %s273_s23  }
  0x12   :  { %267 = dma.done.wait [#allocation3], 2048  }
  0x13   :  { %268 = vsyncadd [#allocation3], 4294965248  ;;  %v274_v0 = vmov 0.0|0.0   ;;  %vm275_vm0 = vmmov 0   ;;  %v276_v1 = vmov 0.0   ;;  %v30_v2 = vld [vmem:[#allocation2] sm:$0xff] }
  0x14   :  { %192 = vmatprep.subr.bf16.mxu0 %v274_v0  ;;  %189 = vmatprep.mubr.msk.f32.mxu0 %vm275_vm0, %v276_v1  ;;  %v31_v3 = vld [vmem:[#allocation2 + $0x8] sm:$0xff]  ;;  %v32_v4 = vld [vmem:[#allocation2 + $0x10] sm:$0xff]  ;;  %v33_v6 = vld [vmem:[#allocation2 + $0x18] sm:$0xff]  ;;  %s277_s29 = smov [#allocation5]  }
  0x15   :  { %v193_v5 = vpack.c.bf16 %v31_v3, %v30_v2  ;;  %v196_v7 = vpack.c.bf16 %v33_v6, %v32_v4  ;;  %v34_v8 = vld [vmem:[#allocation2 + $0x20] sm:$0xff]  ;;  %v35_v9 = vld [vmem:[#allocation2 + $0x28] sm:$0xff]  ;;  %v36_v11 = vld [vmem:[#allocation2 + $0x30] sm:$0xff]  ;;  %s130_s30 = sshll.u32 %s277_s29, 4  ;;  %s131_s30 = int_to_ptr.vmem [resolvable:$true] %s130_s30 }
  0x16   :  { %v199_v10 = vpack.c.bf16 %v35_v9, %v34_v8  ;;  %v37_v12 = vld [vmem:[#allocation2 + $0x38] sm:$0xff]  ;;  %v38_v14 = vld [vmem:[#allocation2 + $0x40] sm:$0xff]  ;;  %v39_v15 = vld [vmem:[#allocation2 + $0x48] sm:$0xff]  ;;  %s245_s4 = scalar_lea.vmem %s131_s30, 128  ;;  %p250_p9 = scmp.lt.s32.totalorder %s131_s30, %s131_s30 }
  0x17   :  { %194 = vmatpush3.bf16.msra.mxu0 %v193_v5  ;;  %v202_v13 = vpack.c.bf16 %v37_v12, %v36_v11  ;;  %v205_v16 = vpack.c.bf16 %v39_v15, %v38_v14  ;;  %v40_v17 = vld [vmem:[#allocation2 + $0x50] sm:$0xff]  ;;  %v41_v18 = vld [vmem:[#allocation2 + $0x58] sm:$0xff]  ;;  %v42_v20 = vld [vmem:[#allocation2 + $0x60] sm:$0xff]  ;;  %p246_p8 = scmp.ne.s32.totalorder %s131_s30, %s245_s4  ;;  %p251_p10 = scmp.lt.s32.totalorder %s245_s4, %s245_s4 }
  0x18   :  { %195 = vmatprep.subr.bf16.mxu0 %v274_v0  ;;  %v208_v19 = vpack.c.bf16 %v41_v18, %v40_v17  ;;  %v43_v21 = vld [vmem:[#allocation2 + $0x68] sm:$0xff]  ;;  %v44_v23 = vld [vmem:[#allocation2 + $0x70] sm:$0xff]  ;;  %v45_v24 = vld [vmem:[#allocation2 + $0x78] sm:$0xff] }
  0x19   :  { %v211_v22 = vpack.c.bf16 %v43_v21, %v42_v20  ;;  %v214_v25 = vpack.c.bf16 %v45_v24, %v44_v23  ;;  %v29_v26 = vld [vmem:[%s328_s0] sm:$0xff]  ;;  %p252_p11 = por %p251_p10, %p250_p9 }
  0x1a   :  { %v139_v27 = vld [vmem:[%s330_s2] ss:$0 sm:$0xff] }
  0x1b   :  { %197 = vmatpush3.bf16.msra.mxu0 %v196_v7  ;;  %p253_p12 = pnand %p252_p11, %p246_p8 }
  0x1c   :  { %198 = vmatprep.subr.bf16.mxu0 %v274_v0 }
  0x1f   :  { %200 = vmatpush3.bf16.msra.mxu0 %v199_v10 }
  0x20   :  { %201 = vmatprep.subr.bf16.mxu0 %v274_v0 }
  0x23   :  { %203 = vmatpush3.bf16.msra.mxu0 %v202_v13 }
  0x24   :  { %204 = vmatprep.subr.bf16.mxu0 %v274_v0 }
  0x27   :  { %206 = vmatpush3.bf16.msra.mxu0 %v205_v16 }
  0x28   :  { %207 = vmatprep.subr.bf16.mxu0 %v274_v0 }
  0x2b   :  { %209 = vmatpush3.bf16.msra.mxu0 %v208_v19 }
  0x2c   :  { %210 = vmatprep.subr.bf16.mxu0 %v274_v0 }
  0x2f   :  { %212 = vmatpush3.bf16.msra.mxu0 %v211_v22 }
  0x30   :  { %213 = vmatprep.subr.bf16.mxu0 %v274_v0 }
  0x33   :  { %215 = vmatpush3.bf16.msra.mxu0 %v214_v25 }
  0x36   :  { %190 = vmatmul.mubr.f32.vlgmr.msra.gmra.mrb[0].mxu0 %v29_v26 }
 0x109   :  { %v119_v28 = vpop.f32.mrb[0].mxu0 }
 0x10a   :  { %v120_v29 = vadd.f32 %v139_v27, %v119_v28  ;;  %v191_v30 = vpop.f32.mrb[1].mxu0 }
 0x10c   :  { %123 = vst [vmem:[#allocation5] sm:$0xff] %v120_v29 }
 0x10d   :  { %256 = shalt.err (!%p253_p12)
}
 0x10e   :  { %s257_s6 = scalar_lea.hbm %s331_s3, 128 }
 0x10f   :  { %p258_p13 = scmp.ne.s32.totalorder %s331_s3, %s257_s6  ;;  %p261_p0 = scmp.lt.u32.totalorder %s257_s6, %s331_s3 }
 0x111   :  { %p263_p1 = pnand %p261_p0, %p258_p13 }
 0x113   :  { %266 = shalt.err (!%p263_p1)
}
 0x114   :  { %133 = dma.vmem_to_hbm [thread:$0]  %s131_s30, 128, %s331_s3, [#allocation4]  }
 0x115   :  { %269 = dma.done.wait [#allocation4], 128  }
 0x116   :  { %270 = vsyncadd [#allocation4], 4294967168 }
 0x117   :  { %137 = vsyncpa [#allocation3], 1 }
 0x118   :  { %138 = vsyncpa [#allocation4], 1 }

</bundles_post_ra>
